<compile_context>
chip_gen: v5e
topology: v5e:2x2
jax: 0.10.0
libtpu: 0.0.40
codegen_flags: <defaults>
</compile_context>

<pallas_src>
from functools import partial

import jax
import jax.numpy as jnp
from jax.experimental import pallas as pl
from jax.experimental.pallas import tpu as pltpu

LANE = 128          # TPU lane width -> lane-dense output padding target
NEG_BIG = -1.0e30   # padded logits -> exp() underflows to exactly 0


def agent_act_kernel(x_ref, w1_ref, b1_ref, w2_ref, b2_ref, o_ref):
    # x: (TB, D_OBS) f32, w1: (D_OBS, HID), b1: (1, HID),
    # w2: (HID, N_PAD) zero-padded, b2: (1, N_PAD) padded with NEG_BIG,
    # o:  (TB, N_PAD)  -- lane-dense store.
    x = x_ref[...]

    # Linear 1 + ReLU  (MXU matmul, f32 accumulate)
    h = jnp.dot(x, w1_ref[...], preferred_element_type=jnp.float32) + b1_ref[...]
    h = jnp.maximum(h, 0.0)

    # Linear 2 -> logits (padded lanes come out ~NEG_BIG via the padded bias)
    logits = jnp.dot(h, w2_ref[...], preferred_element_type=jnp.float32) + b2_ref[...]

    # softmax(dim=-1), numerically stable; padded lanes contribute exp(...) == 0.
    m = jnp.max(logits, axis=-1, keepdims=True)
    e = jnp.exp(logits - m)
    denom = jnp.sum(e, axis=-1, keepdims=True)
    o_ref[...] = (e * pl.reciprocal(denom, approx=True)).astype(o_ref.dtype)


@partial(jax.jit, static_argnames=("tb",))
def agent_act_batched(obs_batch, w1, b1, w2, b2, *, tb=128):
    """softmax(policy(obs_batch), dim=-1) for a batch of observations.

    One pallas_call, grid over batch tiles; weights stay VMEM-resident across steps.
    """
    B, d_obs = obs_batch.shape
    hid = w1.shape[1]
    n_act = w2.shape[1]

    # Pad the output/action dim up to a multiple of 128 lanes (lane-dense stores).
    n_pad = max(LANE, ((n_act + LANE - 1) // LANE) * LANE)
    w2p = jnp.zeros((hid, n_pad), w2.dtype).at[:, :n_act].set(w2)
    b2p = jnp.full((1, n_pad), NEG_BIG, b2.dtype).at[:, :n_act].set(b2)

    # Pad ragged batches up to a multiple of the batch tile instead of asserting.
    tb = min(tb, max(8, B))
    b_pad = ((B + tb - 1) // tb) * tb
    x = obs_batch
    if b_pad != B:
        x = jnp.zeros((b_pad, d_obs), obs_batch.dtype).at[:B, :].set(obs_batch)
    grid = (b_pad // tb,)

    vmem = pltpu.MemorySpace.VMEM
    out = pl.pallas_call(
        agent_act_kernel,
        out_shape=jax.ShapeDtypeStruct((b_pad, n_pad), jnp.float32),
        grid=grid,
        in_specs=[
            # obs tile: streamed per grid step
            pl.BlockSpec((tb, d_obs), lambda i: (i, 0), memory_space=vmem),
            # weights / biases: constant index map -> resident across all steps
            pl.BlockSpec((d_obs, hid), lambda i: (0, 0), memory_space=vmem),
            pl.BlockSpec((1, hid), lambda i: (0, 0), memory_space=vmem),
            pl.BlockSpec((hid, n_pad), lambda i: (0, 0), memory_space=vmem),
            pl.BlockSpec((1, n_pad), lambda i: (0, 0), memory_space=vmem),
        ],
        out_specs=pl.BlockSpec((tb, n_pad), lambda i: (i, 0), memory_space=vmem),
        compiler_params=pltpu.CompilerParams(
            dimension_semantics=("parallel",)  # shard batch tiles across TCs on v7x
        ),
    )(x, w1, b1, w2p, b2p)

    # Drop the lane / batch padding outside the kernel.
    return out[:B, :n_act]


def agent_forward(obs, w1, b1, w2, b2):
    """Pallas equivalent of Agent.forward(obs) for a single observation vector."""
    # obs.unsqueeze(0), padded to a sublane-aligned 8-row tile (extra rows discarded).
    x = jnp.broadcast_to(obs[None, :], (8, obs.shape[0]))
    probs = agent_act_batched(x, w1, b1, w2, b2, tb=8)
    return probs[0]  # .squeeze(dim=0) from process_act


if __name__ == "__main__":
    D_OBS, HID, N_ACT = 32, 32, 8
    B, TB = 256, 128  # batched act(): 2 grid steps of 128 rows each

    key = jax.random.PRNGKey(0)
    k_obs, k_w1, k_b1, k_w2, k_b2 = jax.random.split(key, 5)

    # Deterministic synthetic policy parameters (Linear layers: (in, out) layout).
    obs_batch = jax.random.normal(k_obs, (B, D_OBS), dtype=jnp.float32)
    w1 = jax.random.normal(k_w1, (D_OBS, HID), dtype=jnp.float32) * 0.1
    b1 = jax.random.normal(k_b1, (1, HID), dtype=jnp.float32) * 0.1
    w2 = jax.random.normal(k_w2, (HID, N_ACT), dtype=jnp.float32) * 0.1
    b2 = jax.random.normal(k_b2, (1, N_ACT), dtype=jnp.float32) * 0.1

    # Batched path (the performance-relevant one).
    actions = agent_act_batched(obs_batch, w1, b1, w2, b2, tb=TB)
    jax.block_until_ready(actions)

    # Single-obs forward (original Agent.forward semantics).
    action0 = agent_forward(obs_batch[0], w1, b1, w2, b2)
    jax.block_until_ready(action0)

    # Reference in plain JAX (same semantics as torch MLP + softmax(dim=-1)).
    h_ref = jnp.maximum(obs_batch @ w1 + b1, 0.0)
    ref = jax.nn.softmax(h_ref @ w2 + b2, axis=-1)

    assert actions.shape == (B, N_ACT)
    assert action0.shape == (N_ACT,)
    # approx reciprocal on the EUP -> slightly relaxed tolerance
    assert jnp.allclose(actions, ref, atol=2e-3, rtol=2e-3)
    assert jnp.allclose(action0, ref[0], atol=2e-3, rtol=2e-3)
    assert jnp.allclose(jnp.sum(actions, axis=-1), 1.0, atol=5e-3)

    print("KERNEL_OK")
</pallas_src>

<mosaic_0001>
module attributes {stable_mosaic.version = 11 : i64} {
  func.func @agent_act_kernel(%arg0: i32, %arg1: memref<128x32xf32, #tpu.memory_space<vmem>>, %arg2: memref<32x32xf32, #tpu.memory_space<vmem>>, %arg3: memref<1x32xf32, #tpu.memory_space<vmem>>, %arg4: memref<32x128xf32, #tpu.memory_space<vmem>>, %arg5: memref<1x128xf32, #tpu.memory_space<vmem>>, %arg6: memref<128x128xf32, #tpu.memory_space<vmem>>) attributes {dimension_semantics = [#tpu.dimension_semantics<parallel>], iteration_bounds = array<i64: 2>, scalar_prefetch = 0 : i64, scratch_operands = 0 : i64, tpu.core_type = #tpu.core_type<tc>, window_params = [{transform_indices = @transform_0, window_bounds = array<i64: 128, 32>}, {pipeline_mode = #tpu.pipeline_mode<synchronous>, transform_indices = @transform_1, window_bounds = array<i64: 32, 32>}, {pipeline_mode = #tpu.pipeline_mode<synchronous>, transform_indices = @transform_2, window_bounds = array<i64: 1, 32>}, {pipeline_mode = #tpu.pipeline_mode<synchronous>, transform_indices = @transform_3, window_bounds = array<i64: 32, 128>}, {pipeline_mode = #tpu.pipeline_mode<synchronous>, transform_indices = @transform_4, window_bounds = array<i64: 1, 128>}, {transform_indices = @transform_5, window_bounds = array<i64: 128, 128>}]} {
    %c0 = arith.constant 0 : index
    %c0_0 = arith.constant 0 : index
    %0 = vector.load %arg1[%c0, %c0_0] : memref<128x32xf32, #tpu.memory_space<vmem>>, vector<128x32xf32>
    %c0_1 = arith.constant 0 : index
    %c0_2 = arith.constant 0 : index
    %1 = vector.load %arg2[%c0_1, %c0_2] : memref<32x32xf32, #tpu.memory_space<vmem>>, vector<32x32xf32>
    %cst = arith.constant dense<0.000000e+00> : vector<128x32xf32>
    %2 = tpu.matmul %0, %1, %cst {dimension_numbers = #tpu.dot_dimension_numbers<[1], [0], [0], [1], [0, 0, 1, 1], [], []>} : vector<128x32xf32>, vector<32x32xf32>, vector<128x32xf32> -> vector<128x32xf32>
    %c0_3 = arith.constant 0 : index
    %c0_4 = arith.constant 0 : index
    %3 = vector.load %arg3[%c0_3, %c0_4] : memref<1x32xf32, #tpu.memory_space<vmem>>, vector<1x32xf32>
    %4 = vector.broadcast %3 : vector<1x32xf32> to vector<128x32xf32>
    %5 = arith.addf %2, %4 : vector<128x32xf32>
    %cst_5 = arith.constant 0.000000e+00 : f32
    %6 = vector.broadcast %cst_5 : f32 to vector<128x32xf32>
    %7 = arith.maximumf %5, %6 : vector<128x32xf32>
    %c0_6 = arith.constant 0 : index
    %c0_7 = arith.constant 0 : index
    %8 = vector.load %arg4[%c0_6, %c0_7] : memref<32x128xf32, #tpu.memory_space<vmem>>, vector<32x128xf32>
    %cst_8 = arith.constant dense<0.000000e+00> : vector<128x128xf32>
    %9 = tpu.matmul %7, %8, %cst_8 {dimension_numbers = #tpu.dot_dimension_numbers<[1], [0], [0], [1], [0, 0, 1, 1], [], []>} : vector<128x32xf32>, vector<32x128xf32>, vector<128x128xf32> -> vector<128x128xf32>
    %c0_9 = arith.constant 0 : index
    %c0_10 = arith.constant 0 : index
    %10 = vector.load %arg5[%c0_9, %c0_10] : memref<1x128xf32, #tpu.memory_space<vmem>>, vector<1x128xf32>
    %11 = vector.broadcast %10 : vector<1x128xf32> to vector<128x128xf32>
    %12 = arith.addf %9, %11 : vector<128x128xf32>
    %cst_11 = arith.constant dense<0xFF800000> : vector<128xf32>
    %13 = vector.multi_reduction <maximumf>, %12, %cst_11 [1] : vector<128x128xf32> to vector<128xf32>
    %14 = vector.shape_cast %13 : vector<128xf32> to vector<128x1xf32>
    %15 = vector.broadcast %14 : vector<128x1xf32> to vector<128x128xf32>
    %16 = arith.subf %12, %15 : vector<128x128xf32>
    %17 = math.exp %16 : vector<128x128xf32>
    %cst_12 = arith.constant dense<0.000000e+00> : vector<128xf32>
    %18 = vector.multi_reduction <add>, %17, %cst_12 [1] : vector<128x128xf32> to vector<128xf32>
    %19 = vector.shape_cast %18 : vector<128xf32> to vector<128x1xf32>
    %20 = tpu.reciprocal %19 {approx = true} : vector<128x1xf32> -> vector<128x1xf32>
    %21 = vector.broadcast %20 : vector<128x1xf32> to vector<128x128xf32>
    %22 = arith.mulf %17, %21 : vector<128x128xf32>
    %c0_13 = arith.constant 0 : index
    %c0_14 = arith.constant 0 : index
    %23 = vector.load %arg6[%c0_13, %c0_14] : memref<128x128xf32, #tpu.memory_space<vmem>>, vector<128x128xf32>
    tpu.vector_store %arg6[%c0_13, %c0_14], %22 {strides = array<i32>} : memref<128x128xf32, #tpu.memory_space<vmem>>, vector<128x128xf32>,
    return
  }
  func.func @transform_0(%arg0: i32) -> (i32, i32) {
    %c0_i32 = arith.constant 0 : i32
    %c0_i32_0 = arith.constant 0 : i32
    return %arg0, %c0_i32 : i32, i32
  }
  func.func @transform_1(%arg0: i32) -> (i32, i32) {
    %c0_i32 = arith.constant 0 : i32
    %c0_i32_0 = arith.constant 0 : i32
    %c0_i32_1 = arith.constant 0 : i32
    return %c0_i32, %c0_i32_0 : i32, i32
  }
  func.func @transform_2(%arg0: i32) -> (i32, i32) {
    %c0_i32 = arith.constant 0 : i32
    %c0_i32_0 = arith.constant 0 : i32
    %c0_i32_1 = arith.constant 0 : i32
    return %c0_i32, %c0_i32_0 : i32, i32
  }
  func.func @transform_3(%arg0: i32) -> (i32, i32) {
    %c0_i32 = arith.constant 0 : i32
    %c0_i32_0 = arith.constant 0 : i32
    %c0_i32_1 = arith.constant 0 : i32
    return %c0_i32, %c0_i32_0 : i32, i32
  }
  func.func @transform_4(%arg0: i32) -> (i32, i32) {
    %c0_i32 = arith.constant 0 : i32
    %c0_i32_0 = arith.constant 0 : i32
    %c0_i32_1 = arith.constant 0 : i32
    return %c0_i32, %c0_i32_0 : i32, i32
  }
  func.func @transform_5(%arg0: i32) -> (i32, i32) {
    %c0_i32 = arith.constant 0 : i32
    %c0_i32_0 = arith.constant 0 : i32
    return %arg0, %c0_i32 : i32, i32
  }
}

</mosaic_0001>

<bundles_post_ra>
// kernel: agent_act_batched.1
= control target key start
LH: loop header
LB: loop body
LE: loop exit
PB: predicated region body
PF: predicated region fallthrough
CT: control target
= control target key end

     0   :  { %s882_s18 = smov 0   ;;  %s1108_s0 = inlined_call_operand.vmem [shape: f32[256,32], index: 0, kind: input, shape index: {}]   ;;  %s1109_s1 = inlined_call_operand.vmem [shape: f32[32,32], index: 1, kind: input, shape index: {}]   ;;  %s1110_s2 = inlined_call_operand.vmem [shape: f32[1,32], index: 2, kind: input, shape index: {}]   ;;  %s1111_s3 = inlined_call_operand.vmem [shape: f32[32,128], index: 3, kind: input, shape index: {}]   ;;  %s1112_s4 = inlined_call_operand.vmem [shape: f32[1,128], index: 4, kind: input, shape index: {}]   ;;  %s1113_s5 = inlined_call_operand.vmem [shape: f32[256,128], index: 5, kind: output, shape index: {}]  }
   0x1 LB: > { %s719_s19 = sadd.s32 4294967295, %s850_s18   ;;  %p723_p0 = scmp.ge.s32.totalorder %s850_s18, 1  ;;  %s850_s18 = sphi %s882_s18, %s15_s18  }
   0x2   : > { %p188_p1 = scmp.lt.s32.totalorder %s850_s18, 3 }
   0x4   : > { %p189_p2 = pnand %p723_p0, %p188_p1 }
   0x5   : > { %s724_s24 = sshll.u32 (!%p189_p2), %s719_s19, 4 }
   0x6   : > { %192 = sbr.rel (%p189_p2) target bundleno = 598 (0x256), region = 40  ;;  %p217_p3 = scmp.lt.s32.totalorder (!%p189_p2), %s724_s24, 31 }
   0xb   : > { %v247_v0 = vld [vmem:[%s1109_s1 + $0x18] sm:$0xff]  ;;  %v246_v1 = vld [vmem:[%s1109_s1 + $0x10] sm:$0xff]  ;;  %v245_v2 = vld [vmem:[%s1109_s1 + $0x8] sm:$0xff]  ;;  %s1115_s24 = smov (!%p217_p3, %s724_s24), 31  ;;  %vm252_vm0 = vcmask 261120  }
   0xc   : > { %313 = vmatpush.msra.mxu0 %v247_v0  ;;  %762 = vmatpush.msra.mxu2 %v247_v0  ;;  %v244_v3 = vld [vmem:[%s1109_s1] sm:$0xff]  ;;  %s725_s29 = sshll.u32 %s1115_s24, 3  ;;  %v385_v12 = vld [vmem:[%s1111_s3 + $0x18] sm:$0xff]  ;;  %v384_v21 = vld [vmem:[%s1111_s3 + $0x10] sm:$0xff] }
   0xd   : > { %s910_s7 = scalar_lea.vmem %s1108_s0, %s725_s29  ;;  %450 = vmatpush.msra.mxu1 %v385_v12  ;;  %766 = vmatpush.msra.mxu3 %v385_v12  ;;  %v383_v22 = vld [vmem:[%s1111_s3 + $0x8] sm:$0xff]  ;;  %v382_v23 = vld [vmem:[%s1111_s3] sm:$0xff]  ;;  %s1071_s23 = scalar_lea.vmem %s1113_s5, %s725_s29 }
   0xe   : > { %314 = vmatpush.msra.mxu0 %v246_v1  ;;  %763 = vmatpush.msra.mxu2 %v246_v1  ;;  %v228_v4 = vld [vmem:[%s910_s7] sm:$0xff]  ;;  %v229_v6 = vld [vmem:[%s910_s7 + $0x8] sm:$0xff]  ;;  %v230_v8 = vld [vmem:[%s910_s7 + $0x10] sm:$0xff] }
   0xf   : > { %v236_v5 = vld [vmem:[%s910_s7 + $0x40] sm:$0xff]  ;;  %v237_v7 = vld [vmem:[%s910_s7 + $0x48] sm:$0xff]  ;;  %v238_v9 = vld [vmem:[%s910_s7 + $0x50] sm:$0xff]  ;;  %451 = vmatpush.msra.mxu1 %v384_v21  ;;  %767 = vmatpush.msra.mxu3 %v384_v21 }
  0x10   : > { %315 = vmatpush.msra.mxu0 %v245_v2  ;;  %764 = vmatpush.msra.mxu2 %v245_v2  ;;  %v231_v10 = vld [vmem:[%s910_s7 + $0x18] sm:$0xff]  ;;  %v232_v13 = vld [vmem:[%s910_s7 + $0x20] sm:$0xff]  ;;  %v233_v15 = vld [vmem:[%s910_s7 + $0x28] sm:$0xff] }
  0x11   : > { %v239_v11 = vld [vmem:[%s910_s7 + $0x58] sm:$0xff]  ;;  %v240_v14 = vld [vmem:[%s910_s7 + $0x60] sm:$0xff]  ;;  %v241_v16 = vld [vmem:[%s910_s7 + $0x68] sm:$0xff]  ;;  %452 = vmatpush.msra.mxu1 %v383_v22  ;;  %768 = vmatpush.msra.mxu3 %v383_v22 }
  0x12   : > { %316 = vmatpush.msra.mxu0 %v244_v3  ;;  %765 = vmatpush.msra.mxu2 %v244_v3  ;;  %v234_v17 = vld [vmem:[%s910_s7 + $0x30] sm:$0xff]  ;;  %v235_v19 = vld [vmem:[%s910_s7 + $0x38] sm:$0xff]  ;;  %v778_v24 = vld [vmem:[%s1110_s2] ss:$0 sm:$0xff] }
  0x13   : > { %728 = vmatmul.msk.f32.vlgmr.msra.gmra.mxu0 %vm252_vm0, %v228_v4  ;;  %736 = vmatmul.msk.f32.vlgmr.msra.gmra.mxu2 %vm252_vm0, %v236_v5  ;;  %v242_v18 = vld [vmem:[%s910_s7 + $0x70] sm:$0xff]  ;;  %v243_v20 = vld [vmem:[%s910_s7 + $0x78] sm:$0xff] }
  0x14   : > { %453 = vmatpush.msra.mxu1 %v382_v23  ;;  %769 = vmatpush.msra.mxu3 %v382_v23 }
  0x1b   : > { %729 = vmatmul.msk.f32.gmra.mxu0 %vm252_vm0, %v229_v6  ;;  %737 = vmatmul.msk.f32.gmra.mxu2 %vm252_vm0, %v237_v7 }
  0x23   : > { %730 = vmatmul.msk.f32.gmra.mxu0 %vm252_vm0, %v230_v8  ;;  %738 = vmatmul.msk.f32.gmra.mxu2 %vm252_vm0, %v238_v9  ;;  %v779_v9 = vld [vmem:[%s1112_s4] ss:$0 sm:$0xff] }
  0x2b   : > { %731 = vmatmul.msk.f32.gmra.mxu0 %vm252_vm0, %v231_v10  ;;  %739 = vmatmul.msk.f32.gmra.mxu2 %vm252_vm0, %v239_v11 }
  0x33   : > { %732 = vmatmul.msk.f32.gmra.mxu0 %vm252_vm0, %v232_v13  ;;  %740 = vmatmul.msk.f32.gmra.mxu2 %vm252_vm0, %v240_v14 }
  0x3b   : > { %733 = vmatmul.msk.f32.gmra.mxu0 %vm252_vm0, %v233_v15  ;;  %741 = vmatmul.msk.f32.gmra.mxu2 %vm252_vm0, %v241_v16 }
  0x43   : > { %734 = vmatmul.msk.f32.gmra.mxu0 %vm252_vm0, %v234_v17  ;;  %742 = vmatmul.msk.f32.gmra.mxu2 %vm252_vm0, %v242_v18 }
  0x4b   : > { %735 = vmatmul.msk.f32.gmra.mxu0 %vm252_vm0, %v235_v19  ;;  %743 = vmatmul.msk.f32.gmra.mxu2 %vm252_vm0, %v243_v20 }
  0x90   : > { %v318_v25 = vpop.f32.mrf.mxu0 }
  0x91   : > { %v319_v26 = vadd.f32 %v778_v24, %v318_v25 }
  0x93   : > { %v366_v27 = vmax.f32 %v319_v26, 0.0 }
  0x95   : > { %744 = vmatmul.msk.f32.vlgmr.msra.gmra.mxu1 %vm252_vm0, %v366_v27 }
  0x96   : > { %v342_v28 = vpop.f32.mrf.mxu2 }
  0x97   : > { %v343_v29 = vadd.f32 %v778_v24, %v342_v28 }
  0x98   : > { %v321_v30 = vpop.f32.mrf.mxu0 }
  0x99   : > { %v374_v31 = vmax.f32 %v343_v29, 0.0  ;;  %v322_v32 = vadd.f32 %v778_v24, %v321_v30 }
  0x9b   : > { %v367_v33 = vmax.f32 %v322_v32, 0.0  ;;  %752 = vmatmul.msk.f32.vlgmr.msra.gmra.mxu3 %vm252_vm0, %v374_v31 }
  0x9d   : > { %745 = vmatmul.msk.f32.gmra.mxu1 %vm252_vm0, %v367_v33 }
  0x9e   : > { %v345_v34 = vpop.f32.mrf.mxu2 }
  0x9f   : > { %v346_v35 = vadd.f32 %v778_v24, %v345_v34 }
  0xa0   : > { %v324_v36 = vpop.f32.mrf.mxu0 }
  0xa1   : > { %v375_v37 = vmax.f32 %v346_v35, 0.0  ;;  %v325_v38 = vadd.f32 %v778_v24, %v324_v36 }
  0xa3   : > { %v368_v39 = vmax.f32 %v325_v38, 0.0  ;;  %753 = vmatmul.msk.f32.gmra.mxu3 %vm252_vm0, %v375_v37 }
  0xa5   : > { %746 = vmatmul.msk.f32.gmra.mxu1 %vm252_vm0, %v368_v39 }
  0xa6   : > { %v348_v40 = vpop.f32.mrf.mxu2 }
  0xa7   : > { %v349_v41 = vadd.f32 %v778_v24, %v348_v40 }
  0xa8   : > { %v327_v42 = vpop.f32.mrf.mxu0 }
  0xa9   : > { %v376_v43 = vmax.f32 %v349_v41, 0.0  ;;  %v328_v44 = vadd.f32 %v778_v24, %v327_v42 }
  0xab   : > { %v369_v45 = vmax.f32 %v328_v44, 0.0  ;;  %754 = vmatmul.msk.f32.gmra.mxu3 %vm252_vm0, %v376_v43 }
  0xad   : > { %747 = vmatmul.msk.f32.gmra.mxu1 %vm252_vm0, %v369_v45 }
  0xae   : > { %v351_v46 = vpop.f32.mrf.mxu2 }
  0xaf   : > { %v352_v47 = vadd.f32 %v778_v24, %v351_v46 }
  0xb0   : > { %v330_v48 = vpop.f32.mrf.mxu0 }
  0xb1   : > { %v377_v49 = vmax.f32 %v352_v47, 0.0  ;;  %v331_v50 = vadd.f32 %v778_v24, %v330_v48 }
  0xb3   : > { %v370_v51 = vmax.f32 %v331_v50, 0.0  ;;  %755 = vmatmul.msk.f32.gmra.mxu3 %vm252_vm0, %v377_v49 }
  0xb5   : > { %748 = vmatmul.msk.f32.gmra.mxu1 %vm252_vm0, %v370_v51 }
  0xb6   : > { %v354_v52 = vpop.f32.mrf.mxu2 }
  0xb7   : > { %v355_v53 = vadd.f32 %v778_v24, %v354_v52 }
  0xb8   : > { %v333_v54 = vpop.f32.mrf.mxu0 }
  0xb9   : > { %v378_v55 = vmax.f32 %v355_v53, 0.0  ;;  %v334_v56 = vadd.f32 %v778_v24, %v333_v54 }
  0xbb   : > { %v371_v57 = vmax.f32 %v334_v56, 0.0  ;;  %756 = vmatmul.msk.f32.gmra.mxu3 %vm252_vm0, %v378_v55 }
  0xbd   : > { %749 = vmatmul.msk.f32.gmra.mxu1 %vm252_vm0, %v371_v57 }
  0xbe   : > { %v357_v58 = vpop.f32.mrf.mxu2 }
  0xbf   : > { %v358_v59 = vadd.f32 %v778_v24, %v357_v58 }
  0xc0   : > { %v336_v60 = vpop.f32.mrf.mxu0 }
  0xc1   : > { %v379_v61 = vmax.f32 %v358_v59, 0.0  ;;  %v337_v62 = vadd.f32 %v778_v24, %v336_v60 }
  0xc3   : > { %v372_v63 = vmax.f32 %v337_v62, 0.0  ;;  %757 = vmatmul.msk.f32.gmra.mxu3 %vm252_vm0, %v379_v61 }
  0xc5   : > { %750 = vmatmul.msk.f32.gmra.mxu1 %vm252_vm0, %v372_v63 }
  0xc6   : > { %v360_v0 = vpop.f32.mrf.mxu2 }
  0xc7   : > { %v361_v1 = vadd.f32 %v778_v24, %v360_v0 }
  0xc8   : > { %v339_v2 = vpop.f32.mrf.mxu0 }
  0xc9   : > { %v380_v3 = vmax.f32 %v361_v1, 0.0  ;;  %v340_v4 = vadd.f32 %v778_v24, %v339_v2 }
  0xcb   : > { %v373_v5 = vmax.f32 %v340_v4, 0.0  ;;  %758 = vmatmul.msk.f32.gmra.mxu3 %vm252_vm0, %v380_v3 }
  0xcd   : > { %751 = vmatmul.msk.f32.gmra.mxu1 %vm252_vm0, %v373_v5 }
  0xce   : > { %v363_v6 = vpop.f32.mrf.mxu2 }
  0xcf   : > { %v364_v7 = vadd.f32 %v778_v24, %v363_v6 }
  0xd1   : > { %v381_v8 = vmax.f32 %v364_v7, 0.0 }
  0xd3   : > { %759 = vmatmul.msk.f32.gmra.mxu3 %vm252_vm0, %v381_v8 }
 0x112   : > { %v455_v10 = vpop.f32.mrf.mxu1 }
 0x113   : > { %v456_v11 = vadd.f32 %v779_v9, %v455_v10 }
 0x115   : > { %503 = vmax.xlane.f32.xlu0 %v456_v11 }
 0x11a   : > { %v458_v12 = vpop.f32.mrf.mxu1 }
 0x11b   : > { %v459_v13 = vadd.f32 %v779_v9, %v458_v12 }
 0x11d   : > { %505 = vmax.xlane.f32.xlu0 %v459_v13 }
 0x11e   : > { %v479_v14 = vpop.f32.mrf.mxu3 }
 0x11f   : > { %v480_v15 = vadd.f32 %v779_v9, %v479_v14 }
 0x121   : > { %519 = vmax.xlane.f32.xlu2 %v480_v15 }
 0x122   : > { %v461_v16 = vpop.f32.mrf.mxu1 }
 0x123   : > { %v462_v17 = vadd.f32 %v779_v9, %v461_v16 }
 0x125   : > { %507 = vmax.xlane.f32.xlu1 %v462_v17 }
 0x126   : > { %v482_v18 = vpop.f32.mrf.mxu3 }
 0x127   : > { %v483_v19 = vadd.f32 %v779_v9, %v482_v18 }
 0x129   : > { %521 = vmax.xlane.f32.xlu0 %v483_v19 }
 0x12a   : > { %v464_v20 = vpop.f32.mrf.mxu1 }
 0x12b   : > { %v465_v21 = vadd.f32 %v779_v9, %v464_v20 }
 0x12d   : > { %509 = vmax.xlane.f32.xlu1 %v465_v21 }
 0x12e   : > { %v485_v22 = vpop.f32.mrf.mxu3 }
 0x12f   : > { %v978_v24 = vadd.f32 %v779_v9, %v485_v22 }
 0x132   : > { %v467_v23 = vpop.f32.mrf.mxu1 }
 0x133   : > { %v980_v25 = vadd.f32 %v779_v9, %v467_v23 }
 0x135   : > { %511 = vmax.xlane.f32.xlu2 %v980_v25  ;;  %523 = vmax.xlane.f32.xlu1 %v978_v24 }
 0x136   : > { %v488_v26 = vpop.f32.mrf.mxu3 }
 0x137   : > { %v984_v28 = vadd.f32 %v779_v9, %v488_v26 }
 0x13a   : > { %v470_v27 = vpop.f32.mrf.mxu1 }
 0x13b   : > { %v990_v32 = vadd.f32 %v779_v9, %v470_v27 }
 0x13d   : > { %525 = vmax.xlane.f32.xlu2 %v984_v28 }
 0x13e   : > { %v491_v29 = vpop.f32.mrf.mxu3 }
 0x13f   : > { %v987_v30 = vadd.f32 %v779_v9, %v491_v29 }
 0x141   : > { %527 = vmax.xlane.f32.xlu0 %v987_v30 }
 0x142   : > { %v473_v31 = vpop.f32.mrf.mxu1 }
 0x143   : > { %v992_v33 = vadd.f32 %v779_v9, %v473_v31 }
 0x145   : > { %513 = vmax.xlane.f32.xlu2 %v990_v32 }
 0x146   : > { %v494_v34 = vpop.f32.mrf.mxu3 }
 0x147   : > { %v1002_v39 = vadd.f32 %v779_v9, %v494_v34 }
 0x149   : > { %515 = vmax.xlane.f32.xlu0 %v992_v33 }
 0x14a   : > { %v476_v35 = vpop.f32.mrf.mxu1 }
 0x14b   : > { %v996_v36 = vadd.f32 %v779_v9, %v476_v35 }
 0x14d   : > { %517 = vmax.xlane.f32.xlu1 %v996_v36 }
 0x14e   : > { %v497_v37 = vpop.f32.mrf.mxu3 }
 0x14f   : > { %v999_v38 = vadd.f32 %v779_v9, %v497_v37 }
 0x151   : > { %531 = vmax.xlane.f32.xlu2 %v999_v38 }
 0x155   : > { %529 = vmax.xlane.f32.xlu1 %v1002_v39 }
 0x156   : > { %v500_v40 = vpop.f32.mrf.mxu3 }
 0x157   : > { %v1005_v41 = vadd.f32 %v779_v9, %v500_v40 }
 0x159   : > { %533 = vmax.xlane.f32.xlu0 %v1005_v41 }
 0x188   : > { %v504_v42 = vpop.xlane.xlu0 %503 }
 0x189   : > { %v535_v43 = vsub.f32 %v456_v11, %v504_v42 }
 0x18b   : > { %v551_v44 = vmul.f32 1.442695, %v535_v43 }
 0x18d   : > { %780 = vpow2.f32 %v551_v44 }
 0x190   : > { %v506_v45 = vpop.xlane.xlu0 %505 }
 0x191   : > { %v536_v46 = vsub.f32 %v459_v13, %v506_v45 }
 0x193   : > { %v1008_v47 = vpop.eup %780  ;;  %v553_v48 = vmul.f32 1.442695, %v536_v46 }
 0x194   : > { %v520_v49 = vpop.xlane.xlu2 %519  ;;  %583 = vadd.xlane.f32.xlu1 %v1008_v47 }
 0x195   : > { %782 = vpow2.f32 %v553_v48  ;;  %v543_v50 = vsub.f32 %v480_v15, %v520_v49 }
 0x197   : > { %v567_v51 = vmul.f32 1.442695, %v543_v50 }
 0x198   : > { %v508_v52 = vpop.xlane.xlu1 %507 }
 0x199   : > { %784 = vpow2.f32 %v567_v51  ;;  %v537_v53 = vsub.f32 %v462_v17, %v508_v52 }
 0x19b   : > { %v1011_v54 = vpop.eup %782  ;;  %v555_v55 = vmul.f32 1.442695, %v537_v53 }
 0x19c   : > { %585 = vadd.xlane.f32.xlu2 %v1011_v54  ;;  %v522_v56 = vpop.xlane.xlu0 %521 }
 0x19d   : > { %v544_v57 = vsub.f32 %v483_v19, %v522_v56  ;;  %786 = vpow2.f32 %v555_v55 }
 0x19f   : > { %v1014_v58 = vpop.eup %784  ;;  %v569_v59 = vmul.f32 1.442695, %v544_v57 }
 0x1a0   : > { %v510_v60 = vpop.xlane.xlu1 %509  ;;  %599 = vadd.xlane.f32.xlu0 %v1014_v58 }
 0x1a1   : > { %788 = vpow2.f32 %v569_v59  ;;  %v538_v61 = vsub.f32 %v465_v21, %v510_v60 }
 0x1a3   : > { %v557_v62 = vmul.f32 1.442695, %v538_v61  ;;  %v1017_v63 = vpop.eup %786 }
 0x1a5   : > { %790 = vpow2.f32 %v557_v62 }
 0x1a7   : > { %v1019_v0 = vpop.eup %788 }
 0x1a8   : > { %v512_v1 = vpop.xlane.xlu2 %511  ;;  %v524_v2 = vpop.xlane.xlu1 %523  ;;  %587 = vadd.xlane.f32.xlu0 %v1017_v63  ;;  %601 = vadd.xlane.f32.xlu1 %v1019_v0 }
 0x1a9   : > { %v545_v3 = vsub.f32 %v978_v24, %v524_v2  ;;  %v539_v5 = vsub.f32 %v980_v25, %v512_v1 }
 0x1ab   : > { %v571_v4 = vmul.f32 1.442695, %v545_v3  ;;  %v1025_v6 = vpop.eup %790  ;;  %v559_v9 = vmul.f32 1.442695, %v539_v5 }
 0x1ad   : > { %792 = vpow2.f32 %v571_v4 }
 0x1b0   : > { %v526_v7 = vpop.xlane.xlu2 %525  ;;  %589 = vadd.xlane.f32.xlu1 %v1025_v6 }
 0x1b1   : > { %v546_v8 = vsub.f32 %v984_v28, %v526_v7 }
 0x1b3   : > { %v573_v10 = vmul.f32 1.442695, %v546_v8  ;;  %v1029_v11 = vpop.eup %792 }
 0x1b4   : > { %v528_v12 = vpop.xlane.xlu0 %527  ;;  %603 = vadd.xlane.f32.xlu2 %v1029_v11 }
 0x1b5   : > { %794 = vpow2.f32 %v573_v10  ;;  %v547_v13 = vsub.f32 %v987_v30, %v528_v12 }
 0x1b6   : > { %796 = vpow2.f32 %v559_v9 }
 0x1b7   : > { %v575_v14 = vmul.f32 1.442695, %v547_v13 }
 0x1b8   : > { %v514_v15 = vpop.xlane.xlu2 %513 }
 0x1b9   : > { %798 = vpow2.f32 %v575_v14  ;;  %v540_v16 = vsub.f32 %v990_v32, %v514_v15 }
 0x1bb   : > { %v1034_v17 = vpop.eup %794  ;;  %v561_v18 = vmul.f32 1.442695, %v540_v16 }
 0x1bc   : > { %v1036_v19 = vpop.eup %796  ;;  %605 = vadd.xlane.f32.xlu0 %v1034_v17  ;;  %v516_v20 = vpop.xlane.xlu0 %515 }
 0x1bd   : > { %800 = vpow2.f32 %v561_v18  ;;  %591 = vadd.xlane.f32.xlu2 %v1036_v19  ;;  %v541_v21 = vsub.f32 %v992_v33, %v516_v20 }
 0x1bf   : > { %v1041_v22 = vpop.eup %798  ;;  %v563_v23 = vmul.f32 1.442695, %v541_v21 }
 0x1c0   : > { %v518_v24 = vpop.xlane.xlu1 %517  ;;  %607 = vadd.xlane.f32.xlu1 %v1041_v22 }
 0x1c1   : > { %802 = vpow2.f32 %v563_v23  ;;  %v542_v25 = vsub.f32 %v996_v36, %v518_v24 }
 0x1c3   : > { %v1045_v26 = vpop.eup %800  ;;  %v565_v27 = vmul.f32 1.442695, %v542_v25 }
 0x1c4   : > { %v532_v28 = vpop.xlane.xlu2 %531  ;;  %593 = vadd.xlane.f32.xlu0 %v1045_v26 }
 0x1c5   : > { %804 = vpow2.f32 %v565_v27  ;;  %v549_v29 = vsub.f32 %v999_v38, %v532_v28 }
 0x1c7   : > { %v1049_v30 = vpop.eup %802  ;;  %v579_v31 = vmul.f32 1.442695, %v549_v29 }
 0x1c8   : > { %v530_v32 = vpop.xlane.xlu1 %529  ;;  %595 = vadd.xlane.f32.xlu1 %v1049_v30 }
 0x1c9   : > { %806 = vpow2.f32 %v579_v31  ;;  %v548_v33 = vsub.f32 %v1002_v39, %v530_v32 }
 0x1cb   : > { %v1053_v34 = vpop.eup %804  ;;  %v577_v35 = vmul.f32 1.442695, %v548_v33 }
 0x1cc   : > { %597 = vadd.xlane.f32.xlu2 %v1053_v34  ;;  %v534_v36 = vpop.xlane.xlu0 %533 }
 0x1cd   : > { %808 = vpow2.f32 %v577_v35  ;;  %v550_v37 = vsub.f32 %v1005_v41, %v534_v36 }
 0x1cf   : > { %v1057_v38 = vpop.eup %806  ;;  %v581_v40 = vmul.f32 1.442695, %v550_v37 }
 0x1d0   : > { %611 = vadd.xlane.f32.xlu0 %v1057_v38 }
 0x1d1   : > { %810 = vpow2.f32 %v581_v40 }
 0x1d3   : > { %v1060_v42 = vpop.eup %808 }
 0x1d4   : > { %609 = vadd.xlane.f32.xlu2 %v1060_v42 }
 0x1d7   : > { %v1063_v39 = vpop.eup %810 }
 0x1d8   : > { %613 = vadd.xlane.f32.xlu1 %v1063_v39 }
 0x207   : > { %v584_v43 = vpop.xlane.xlu1 %583 }
 0x208   : > { %812 = vrcp.f32 %v584_v43 }
 0x20e   : > { %v813_v44 = vpop.eup %812 }
 0x20f   : > { %v631_v41 = vmul.f32 %v813_v44, %v1008_v47  ;;  %v586_v45 = vpop.xlane.xlu2 %585 }
 0x210   : > { %814 = vrcp.f32 %v586_v45 }
 0x211   : > { %647 = vst [vmem:[%s1071_s23] sm:$0xff] %v631_v41 }
 0x213   : > { %v600_v46 = vpop.xlane.xlu0 %599 }
 0x214   : > { %816 = vrcp.f32 %v600_v46 }
 0x216   : > { %v815_v48 = vpop.eup %814 }
 0x217   : > { %v632_v49 = vmul.f32 %v815_v48, %v1011_v54 }
 0x219   : > { %648 = vst [vmem:[%s1071_s23 + $0x8] sm:$0xff] %v632_v49 }
 0x21a   : > { %v817_v50 = vpop.eup %816 }
 0x21b   : > { %v639_v51 = vmul.f32 %v817_v50, %v1014_v58  ;;  %v602_v52 = vpop.xlane.xlu1 %601  ;;  %v588_v53 = vpop.xlane.xlu0 %587 }
 0x21c   : > { %818 = vrcp.f32 %v602_v52 }
 0x21d   : > { %655 = vst [vmem:[%s1071_s23 + $0x40] sm:$0xff] %v639_v51  ;;  %820 = vrcp.f32 %v588_v53 }
 0x222   : > { %v819_v47 = vpop.eup %818 }
 0x223   : > { %v821_v55 = vpop.eup %820  ;;  %v640_v56 = vmul.f32 %v819_v47, %v1019_v0  ;;  %v590_v57 = vpop.xlane.xlu1 %589 }
 0x224   : > { %v633_v59 = vmul.f32 %v821_v55, %v1017_v63  ;;  %822 = vrcp.f32 %v590_v57 }
 0x225   : > { %656 = vst [vmem:[%s1071_s23 + $0x48] sm:$0xff] %v640_v56 }
 0x226   : > { %649 = vst [vmem:[%s1071_s23 + $0x10] sm:$0xff] %v633_v59 }
 0x227   : > { %v604_v54 = vpop.xlane.xlu2 %603 }
 0x228   : > { %824 = vrcp.f32 %v604_v54 }
 0x22a   : > { %v823_v58 = vpop.eup %822 }
 0x22b   : > { %v634_v60 = vmul.f32 %v823_v58, %v1025_v6 }
 0x22d   : > { %650 = vst [vmem:[%s1071_s23 + $0x18] sm:$0xff] %v634_v60 }
 0x22e   : > { %v825_v61 = vpop.eup %824 }
 0x22f   : > { %v606_v62 = vpop.xlane.xlu0 %605  ;;  %v641_v1 = vmul.f32 %v825_v61, %v1029_v11 }
 0x230   : > { %v592_v0 = vpop.xlane.xlu2 %591  ;;  %826 = vrcp.f32 %v606_v62 }
 0x231   : > { %828 = vrcp.f32 %v592_v0  ;;  %657 = vst [vmem:[%s1071_s23 + $0x50] sm:$0xff] %v641_v1 }
 0x233   : > { %v608_v63 = vpop.xlane.xlu1 %607 }
 0x234   : > { %830 = vrcp.f32 %v608_v63 }
 0x236   : > { %v827_v2 = vpop.eup %826 }
 0x237   : > { %v829_v3 = vpop.eup %828  ;;  %v642_v4 = vmul.f32 %v827_v2, %v1034_v17  ;;  %v594_v5 = vpop.xlane.xlu0 %593 }
 0x238   : > { %v635_v6 = vmul.f32 %v829_v3, %v1036_v19  ;;  %832 = vrcp.f32 %v594_v5 }
 0x239   : > { %658 = vst [vmem:[%s1071_s23 + $0x58] sm:$0xff] %v642_v4 }
 0x23a   : > { %v831_v7 = vpop.eup %830  ;;  %651 = vst [vmem:[%s1071_s23 + $0x20] sm:$0xff] %v635_v6 }
 0x23b   : > { %v643_v8 = vmul.f32 %v831_v7, %v1041_v22  ;;  %v596_v9 = vpop.xlane.xlu1 %595 }
 0x23c   : > { %834 = vrcp.f32 %v596_v9 }
 0x23d   : > { %659 = vst [vmem:[%s1071_s23 + $0x60] sm:$0xff] %v643_v8 }
 0x23e   : > { %v833_v10 = vpop.eup %832 }
 0x23f   : > { %v636_v11 = vmul.f32 %v833_v10, %v1045_v26  ;;  %v598_v12 = vpop.xlane.xlu2 %597 }
 0x240   : > { %836 = vrcp.f32 %v598_v12 }
 0x241   : > { %652 = vst [vmem:[%s1071_s23 + $0x28] sm:$0xff] %v636_v11 }
 0x242   : > { %v835_v13 = vpop.eup %834 }
 0x243   : > { %v637_v14 = vmul.f32 %v835_v13, %v1049_v30  ;;  %v612_v15 = vpop.xlane.xlu0 %611 }
 0x244   : > { %838 = vrcp.f32 %v612_v15 }
 0x245   : > { %653 = vst [vmem:[%s1071_s23 + $0x30] sm:$0xff] %v637_v14 }
 0x246   : > { %v837_v16 = vpop.eup %836 }
 0x247   : > { %v638_v17 = vmul.f32 %v837_v16, %v1053_v34  ;;  %v610_v18 = vpop.xlane.xlu2 %609 }
 0x248   : > { %840 = vrcp.f32 %v610_v18 }
 0x249   : > { %654 = vst [vmem:[%s1071_s23 + $0x38] sm:$0xff] %v638_v17 }
 0x24a   : > { %v839_v19 = vpop.eup %838 }
 0x24b   : > { %v645_v20 = vmul.f32 %v839_v19, %v1057_v38  ;;  %v614_v21 = vpop.xlane.xlu1 %613 }
 0x24c   : > { %842 = vrcp.f32 %v614_v21 }
 0x24d   : > { %661 = vst [vmem:[%s1071_s23 + $0x70] sm:$0xff] %v645_v20 }
 0x24e   : > { %v841_v22 = vpop.eup %840 }
 0x24f   : > { %v644_v23 = vmul.f32 %v841_v22, %v1060_v42 }
 0x251   : > { %660 = vst [vmem:[%s1071_s23 + $0x68] sm:$0xff] %v644_v23 }
 0x252   : > { %v843_v24 = vpop.eup %842 }
 0x253   : > { %v646_v25 = vmul.f32 %v843_v24, %v1063_v39 }
 0x255   : > { %662 = vst [vmem:[%s1071_s23 + $0x78] sm:$0xff] %v646_v25 }
 0x256 PF: > { %s15_s18 = sadd.s32 1, %s850_s18  }
 0x257   : > { %p12_p4 = scmp.ge.s32.totalorder %s15_s18, 4  }
 0x259   :  { %14 = sbr.rel (!%p12_p4) target bundleno = 1 (0x1), region = 70 }

</bundles_post_ra>
